<compile_context>
chip_gen: v7x
topology: tpu7x:2x2x1
jax: 0.10.0
libtpu: 0.0.40
codegen_flags: <defaults>
</compile_context>

<pallas_src>
import jax
import jax.numpy as jnp
from jax.experimental import pallas as pl
from jax.experimental.pallas import tpu as pltpu

_LANE = 128
_SUBLANE = 8


def _hw_budget():
    """Returns (per-input-block bytes, vmem_limit_bytes or None, max row tile)."""
    try:
        phys = int(pltpu.get_tpu_info().vmem_capacity_bytes)
    except Exception:
        phys = 0
    if phys >= (64 << 20):
        # v5e / v6e (128 MiB) and v7x (64 MiB per TC): 2 inputs x 2 pipeline
        # buffers x 8 MiB = 32 MiB of input buffers + small output, safely
        # under a 48 MiB scoped limit and under v7x's 64 MiB physical VMEM.
        return 8 << 20, 48 << 20, 512
    # Unknown / small-VMEM part: stay inside the default scoped-VMEM budget.
    return 2 << 20, None, 256


def _pick_row_tile(rows, t_r_max, align):
    """Row (sublane) tile: a multiple of `align` (or the full extent) that
    divides `rows` exactly when possible, capped so the parallel grid axis has
    >= 2 tiles whenever rows allow (keeps both v7x TensorCores busy)."""
    if rows <= align:
        return rows                                    # full extent (always legal)
    if rows % align != 0:
        if rows <= t_r_max:
            return rows                                # full extent
        return t_r_max // align * align                # ragged last row tile (writes clipped)
    cap = min(t_r_max, rows)
    if rows >= 2 * align:                              # aim for >= 2 row tiles
        cap = min(cap, max(align, (rows // 2) // align * align))
    t = cap // align * align
    while t > align:
        if rows % t == 0:
            return t
        t -= align
    return align


def _pick_col_tile(cols, max_elems):
    """Feature (lane) tile and whether the last tile is ragged.  Prefers a
    tile that covers or divides `cols` exactly (no wrapper padding, no mask);
    otherwise uses the largest 128-multiple tile and masks the tail in-kernel
    (partial blocks only DMA the valid region, so no HBM traffic is wasted)."""
    max_elems = max(max_elems, _LANE)
    if cols <= max_elems:
        return cols, False                             # single full-extent tile
    cap = max_elems // _LANE * _LANE
    if cols % _LANE == 0:
        t = cap
        lo = max(cap // 2, _LANE)                      # don't accept tiny exact divisors
        while t >= lo:
            if cols % t == 0:
                return t, False
            t -= _LANE
    return cap, True                                   # ragged tail, masked in-kernel


def _make_row_sum_kernel(t_c, cols, n_chunks, ragged_cols):
    """Row-sum kernel for fixed (trace-time) tiling parameters.

    The output BlockSpec ignores the feature axis k, so the output block stays
    resident in VMEM across the whole reduction and doubles as accumulator.
    """

    def kernel(pred_ref, truth_ref, out_ref):
        k = pl.program_id(1)

        @pl.when(k == 0)
        def _init():
            out_ref[...] = jnp.zeros_like(out_ref)

        diff = pred_ref[...].astype(jnp.float32) - truth_ref[...].astype(jnp.float32)

        if ragged_cols:
            # Last feature tile sticks out past `cols`; zero those lanes so the
            # stale VMEM of the partial block cannot corrupt the row sums.
            col = jax.lax.broadcasted_iota(jnp.int32, diff.shape, 1) + k * t_c
            diff = jnp.where(col < cols, diff, 0.0)

        if n_chunks:
            # Lane-partial accumulation: pure VPU adds over 128-lane chunks,
            # accumulated into a lane-dense (t_r, 128) output block.
            part = diff[:, 0:_LANE]
            for j in range(1, n_chunks):
                part = part + diff[:, j * _LANE:(j + 1) * _LANE]
            out_ref[...] += part
        else:
            # Fallback (lane extent not a multiple of 128, or too many chunks):
            # one cross-lane reduce per step into a (t_r, 1) block.
            out_ref[...] += jnp.sum(diff, axis=1, keepdims=True)

    return kernel


def loss_mse(pred, truth, *, use_pallas=None, max_block_bytes=None):
    """Pallas TPU implementation of the PyTorch `loss_mse` forward pass.

    pred, truth : (N, C, H, W); any float dtype (bf16 flows through uncast,
                  the upcast to f32 happens inside the kernel).
    use_pallas  : None = auto (plain-XLA fast path below ~2 MiB of input);
                  True/False forces the choice.
    max_block_bytes : optional cap on the per-input block size (testing/tuning).
    """
    if pred.shape != truth.shape or pred.ndim != 4:
        raise ValueError(f"expected matching NCHW inputs, got {pred.shape} / {truth.shape}")
    n, c, h, w = pred.shape
    d = c * h * w
    itemsize = max(jnp.dtype(pred.dtype).itemsize, jnp.dtype(truth.dtype).itemsize)

    if use_pallas is None:
        use_pallas = 2 * pred.size * itemsize >= (2 << 20)
    if not use_pallas:
        # Tiny inputs: fixed Pallas overhead dominates; one fused XLA expr wins.
        diff = pred.astype(jnp.float32).reshape(n, d) - truth.astype(jnp.float32).reshape(n, d)
        m = jnp.mean(diff, axis=1)
        return jnp.mean(m * m)

    # Present each sample as `pack` rows so small-N inputs still fill vreg
    # sublanes; the row-major reshape keeps per-sample sums exact and is free
    # (metadata-only) for contiguous NCHW inputs.
    pack = _SUBLANE if d % _SUBLANE == 0 else 1
    rows, cols = n * pack, d // pack
    pred2 = pred.reshape(rows, cols)
    truth2 = truth.reshape(rows, cols)

    block_bytes, vmem_limit, t_r_max = _hw_budget()
    if max_block_bytes is not None:
        block_bytes = min(block_bytes, max_block_bytes)

    align_r = _SUBLANE * max(1, 4 // itemsize)          # 8 f32, 16 bf16, 32 int8/fp8
    t_r = _pick_row_tile(rows, t_r_max, align_r)
    max_elems = max(block_bytes // (t_r * itemsize), _LANE)
    t_c, ragged_cols = _pick_col_tile(cols, max_elems)

    n_chunks = t_c // _LANE if t_c % _LANE == 0 else 0
    if n_chunks > 64:                                   # avoid huge unrolls
        n_chunks = 0
    out_w = _LANE if n_chunks else 1

    grid = (pl.cdiv(rows, t_r), pl.cdiv(cols, t_c))     # reduction axis last

    compiler_kwargs = dict(dimension_semantics=("parallel", "arbitrary"))
    if vmem_limit is not None:
        compiler_kwargs["vmem_limit_bytes"] = vmem_limit

    partial = pl.pallas_call(
        _make_row_sum_kernel(t_c=t_c, cols=cols, n_chunks=n_chunks, ragged_cols=ragged_cols),
        out_shape=jax.ShapeDtypeStruct((rows, out_w), jnp.float32),
        grid_spec=pltpu.PrefetchScalarGridSpec(
            num_scalar_prefetch=0,
            grid=grid,
            in_specs=[
                pl.BlockSpec((t_r, t_c), lambda i, k: (i, k)),
                pl.BlockSpec((t_r, t_c), lambda i, k: (i, k)),
            ],
            out_specs=pl.BlockSpec((t_r, out_w), lambda i, k: (i, 0)),
        ),
        compiler_params=pltpu.CompilerParams(**compiler_kwargs),
    )(pred2, truth2)

    # Tiny epilogue (O(N * pack * out_w) elements): cross-lane reduce, regroup
    # rows per sample, then one fused 1/(D*D*N) scale.
    row_sums = jnp.sum(partial, axis=1)                       # (rows,)
    sample_sums = jnp.sum(row_sums.reshape(n, pack), axis=1)  # (N,)
    return jnp.sum(sample_sums * sample_sums) * (1.0 / (float(d) * float(d) * float(n)))


if __name__ == "__main__":
    def ref_loss(p, t):
        nn = p.shape[0]
        dd = p.shape[1] * p.shape[2] * p.shape[3]
        m = jnp.mean((p.astype(jnp.float32) - t.astype(jnp.float32)).reshape(nn, dd), axis=1)
        return jnp.mean(m * m)

    key = jax.random.PRNGKey(0)
    cases = [
        # (shape, kwargs) -- force the Pallas path and exercise each tiling branch
        ((2, 4, 16, 16), dict(use_pallas=True)),                          # rows=16 -> 2 row tiles
        ((3, 4, 16, 16), dict(use_pallas=True)),                          # odd batch, 3 row tiles
        ((3, 3, 10, 10), dict(use_pallas=True)),                          # d % 8 != 0: pack=1, narrow out
        ((2, 8, 32, 32), dict(use_pallas=True, max_block_bytes=8192)),    # multi-step reduction axis
        ((2, 10, 16, 16), dict(use_pallas=True, max_block_bytes=8192)),   # ragged last feature tile (mask)
    ]
    for shape, kwargs in cases:
        key, k1, k2 = jax.random.split(key, 3)
        p = jax.random.normal(k1, shape, dtype=jnp.float32)
        t = jax.random.normal(k2, shape, dtype=jnp.float32)
        out = loss_mse(p, t, **kwargs)
        jax.block_until_ready(out)
        ref = ref_loss(p, t)
        assert jnp.allclose(out, ref, rtol=1e-5, atol=1e-6), (shape, out, ref)

    # Auto path on a tiny input takes the fused plain-XLA fast path.
    key, k1, k2 = jax.random.split(key, 3)
    p = jax.random.normal(k1, (2, 4, 16, 16), dtype=jnp.float32)
    t = jax.random.normal(k2, (2, 4, 16, 16), dtype=jnp.float32)
    out = loss_mse(p, t)
    jax.block_until_ready(out)
    assert jnp.allclose(out, ref_loss(p, t), rtol=1e-5, atol=1e-6)

    print("KERNEL_OK")
</pallas_src>

<mosaic_0001>
module attributes {stable_mosaic.version = 11 : i64} {
  func.func @kernel(%arg0: i32, %arg1: i32, %arg2: memref<8x128xf32, #tpu.memory_space<vmem>>, %arg3: memref<8x128xf32, #tpu.memory_space<vmem>>, %arg4: memref<8x128xf32, #tpu.memory_space<vmem>>) attributes {dimension_semantics = [#tpu.dimension_semantics<parallel>, #tpu.dimension_semantics<arbitrary>], iteration_bounds = array<i64: 2, 1>, scalar_prefetch = 0 : i64, scratch_operands = 0 : i64, tpu.core_type = #tpu.core_type<tc>, window_params = [{transform_indices = @transform_0, window_bounds = array<i64: 8, 128>}, {transform_indices = @transform_1, window_bounds = array<i64: 8, 128>}, {transform_indices = @transform_2, window_bounds = array<i64: 8, 128>}]} {
    %c0_i32 = arith.constant 0 : i32
    %0 = arith.cmpi eq, %arg1, %c0_i32 : i32
    %1 = arith.extui %0 : i1 to i32
    %c0_i32_0 = arith.constant 0 : i32
    %2 = arith.cmpi ne, %1, %c0_i32_0 : i32
    scf.if %2 {
      %cst = arith.constant 0.000000e+00 : f32
      %9 = vector.broadcast %cst : f32 to vector<8x128xf32>
      %c0_8 = arith.constant 0 : index
      %c0_9 = arith.constant 0 : index
      %10 = vector.load %arg4[%c0_8, %c0_9] : memref<8x128xf32, #tpu.memory_space<vmem>>, vector<8x128xf32>
      tpu.vector_store %arg4[%c0_8, %c0_9], %9 {strides = array<i32>} : memref<8x128xf32, #tpu.memory_space<vmem>>, vector<8x128xf32>,
    } else {
    }
    %c0 = arith.constant 0 : index
    %c0_1 = arith.constant 0 : index
    %3 = vector.load %arg2[%c0, %c0_1] : memref<8x128xf32, #tpu.memory_space<vmem>>, vector<8x128xf32>
    %c0_2 = arith.constant 0 : index
    %c0_3 = arith.constant 0 : index
    %4 = vector.load %arg3[%c0_2, %c0_3] : memref<8x128xf32, #tpu.memory_space<vmem>>, vector<8x128xf32>
    %5 = arith.subf %3, %4 : vector<8x128xf32>
    %c0_4 = arith.constant 0 : index
    %c0_5 = arith.constant 0 : index
    %6 = vector.load %arg4[%c0_4, %c0_5] : memref<8x128xf32, #tpu.memory_space<vmem>>, vector<8x128xf32>
    %7 = arith.addf %6, %5 : vector<8x128xf32>
    %c0_6 = arith.constant 0 : index
    %c0_7 = arith.constant 0 : index
    %8 = vector.load %arg4[%c0_6, %c0_7] : memref<8x128xf32, #tpu.memory_space<vmem>>, vector<8x128xf32>
    tpu.vector_store %arg4[%c0_6, %c0_7], %7 {strides = array<i32>} : memref<8x128xf32, #tpu.memory_space<vmem>>, vector<8x128xf32>,
    return
  }
  func.func @transform_0(%arg0: i32, %arg1: i32) -> (i32, i32) {
    %c0_i32 = arith.constant 0 : i32
    return %arg0, %arg1 : i32, i32
  }
  func.func @transform_1(%arg0: i32, %arg1: i32) -> (i32, i32) {
    %c0_i32 = arith.constant 0 : i32
    return %arg0, %arg1 : i32, i32
  }
  func.func @transform_2(%arg0: i32, %arg1: i32) -> (i32, i32) {
    %c0_i32 = arith.constant 0 : i32
    %c0_i32_0 = arith.constant 0 : i32
    return %arg0, %c0_i32 : i32, i32
  }
}

</mosaic_0001>

<bundles_post_ra>
// kernel: tpu_custom_call.1
= control target key start
LH: loop header
LB: loop body
LE: loop exit
PB: predicated region body
PF: predicated region fallthrough
CT: control target
= control target key end

     0   :  { %7 = vsyncpa [#allocation3], 0  ;;  %s812_s0 = inlined_call_operand.hbm [shape: f32[16,128], index: 0, kind: input, shape index: {}]   ;;  %s813_s1 = inlined_call_operand.hbm [shape: f32[16,128], index: 1, kind: input, shape index: {}]   ;;  %s814_s2 = inlined_call_operand.hbm [shape: f32[16,128], index: 2, kind: output, shape index: {}]  }
   0x1   :  { %9 = vsyncpa [#allocation3 + $0x1], 0 }
   0x2   :  { %10 = vsyncpa [#allocation6], 0 }
   0x3   :  { %12 = vsyncpa [#allocation6 + $0x1], 0 }
   0x4   :  { %13 = vsyncpa [#allocation4], 0 }
   0x5   :  { %15 = vsyncpa [#allocation4 + $0x1], 0  ;;  %s592_s9 = smov 0   ;;  %s594_s10 = smov 0  }
   0x6   :  { %s596_s11 = smov 0   ;;  %s598_s12 = smov 0  }
   0x7   :  { %s600_s13 = smov 0   ;;  %s602_s14 = smov 0  }
   0x8 LB: > { %s342_s15 = sadd.s32 4294967295, %s572_s14   ;;  %s343_s16 = sadd.s32 4294967294, %s572_s14   ;;  %s572_s14 = sphi %s602_s14, %s21_s14   ;;  %s568_s13 = sphi %s600_s13, %s834_s13   ;;  %s564_s12 = sphi %s598_s12, %s833_s12   ;;  %s560_s11 = sphi %s596_s11, %s832_s11   ;;  %s556_s10 = sphi %s594_s10, %s831_s10   ;;  %s552_s9 = sphi %s592_s9, %s830_s9  }
   0x9   : > { %s33_s17 = sadd.s32 1, %s568_s13  ;;  %s42_s18 = sadd.s32 1, %s560_s11 }
   0xa   : > { %p35_p0 = scmp.ge.s32.totalorder %s33_s17, 2  ;;  %p49_p1 = scmp.ne.s32.totalorder %s560_s11, %s556_s10 }
   0xb   : > { %p50_p2 = scmp.eq.s32.totalorder %s572_s14, 0  ;;  %p55_p3 = scmp.ne.s32.totalorder %s556_s10, %s552_s9 }
   0xc   : > { %s836_s17 = smov (%p35_p0, %s33_s17), 0  ;;  %p56_p5 = scmp.eq.s32.totalorder %s342_s15, 0 }
   0xd   : > { %p633_p4 = por %p50_p2, %p49_p1  ;;  %s37_s20 = ssub.s32 %s568_s13, %s836_s17 }
   0xe   : > { %p107_p6 = scmp.eq.s32.totalorder %s342_s15, 1  ;;  %p40_p7 = scmp.eq.s32.totalorder %s37_s20, 0 }
   0xf   : > { %p639_p8 = por %p56_p5, %p55_p3  ;;  %p113_p10 = scmp.eq.s32.totalorder %s343_s16, 1 }
  0x10   : > { %p643_p9 = por %p107_p6, %p49_p1  ;;  %p375_p13 = scmp.lt.s32.totalorder %s572_s14, 2 }
  0x11   : > { %s818_s21 = scalar_select %p639_p8, 1, 0 }
  0x12   : > { %s819_s22 = scalar_select %p643_p9, 1, 0 }
  0x13   : > { %s648_s23 = scalar_select %p40_p7, %s560_s11, %s42_s18  }
  0x14   : > { %p650_p11 = por %p113_p10, %p55_p3  ;;  %s657_s25 = sand.u32 1, %s560_s11  }
  0x15   : > { %s346_s26 = sshll.u32 %s657_s25, 3  ;;  %s347_s27 = sshll.u32 %s568_s13, 7 }
  0x16   : > { %s820_s24 = scalar_select %p650_p11, 1, 0 }
  0x17   : > { %s666_s30 = scalar_lea.hbm %s812_s0, %s347_s27  ;;  %s137_s3 = scalar_lea.vmem [#allocation2], %s346_s26 }
  0x18   : > { %s145_s4 = sshll.u32 %s137_s3, 4  ;;  %p674_p0 = pnand %p375_p13, %p633_p4  ;;  %s670_s4 = int_to_ptr.vmem [resolvable:$true] %s145_s4 }
  0x19   : > { %s134_s6 = scalar_lea.sflag [#allocation3], %s657_s25  ;;  %s426_s7 = scalar_lea.hbm %s666_s30, 128 }
  0x1a   : > { %p427_p3 = scmp.ne.s32.totalorder %s666_s30, %s426_s7  ;;  %p428_p5 = pneg %p674_p0 }
  0x1b   : > { %s431_s16 = scalar_lea.hbm %s812_s0, 256  ;;  %p432_p4 = scmp.lt.u32.totalorder %s666_s30, %s812_s0 }
  0x1c   : > { %p429_p6 = pnand %p428_p5, %p427_p3  ;;  %p433_p10 = scmp.lt.u32.totalorder %s431_s16, %s426_s7 }
  0x1d   : > { %p435_p12 = scmp.lt.u32.totalorder %s426_s7, %s666_s30 }
  0x1e   : > { %p430_p7 = pneg %p429_p6  ;;  %p434_p13 = por %p433_p10, %p432_p4 }
  0x20   : > { %p436_p1 = por %p435_p12, %p434_p13 }
  0x22   : > { %p437_p2 = pnand %p436_p1, %p430_p7 }
  0x24   : > { %440 = shalt.err (!%p437_p2)
}
  0x25   : > { %s441_s20 = scalar_lea.vmem %s670_s4, 128  ;;  %s574_s28 = smov [#allocation2]  }
  0x26   : > { %p442_p3 = scmp.ne.s32.totalorder %s670_s4, %s441_s20  ;;  %s446_s29 = sshll.u32 %s574_s28, 4  ;;  %s447_s29 = int_to_ptr.vmem [resolvable:$false] %s446_s29 }
  0x27   : > { %s448_s3 = scalar_lea.vmem %s447_s29, 256  ;;  %p449_p9 = scmp.lt.s32.totalorder %s670_s4, %s447_s29 }
  0x28   : > { %p444_p6 = pnand %p442_p3, %p428_p5  ;;  %p450_p4 = scmp.lt.s32.totalorder %s448_s3, %s441_s20 }
  0x2a   : > { %p445_p11 = pneg %p444_p6  ;;  %p451_p10 = por %p450_p4, %p449_p9 }
  0x2c   : > { %p452_p12 = pnand %p451_p10, %p445_p11 }
  0x2e   : > { %455 = shalt.err (!%p452_p12)
}
  0x2f   : > { %367 = dma.hbm_to_vmem [thread:$0]  (!%p674_p0), %s666_s30, 128, %s670_s4, %s134_s6  }
  0x30   : > { %p822_p1 = scmp.lt.s32.totalorder %s572_s14, 3  ;;  %p823_p2 = scmp.ge.s32.totalorder %s572_s14, 1 }
  0x31   : > { %s719_s16 = scalar_lea.hbm %s813_s1, %s347_s27  ;;  %s156_s18 = scalar_lea.vmem [#allocation5], %s346_s26 }
  0x32   : > { %p710_p7 = pnand %p823_p2, %p822_p1  ;;  %s164_s19 = sshll.u32 %s156_s18, 4  ;;  %s165_s19 = int_to_ptr.vmem [resolvable:$true] %s164_s19 }
  0x33   : > { %s153_s30 = scalar_lea.sflag [#allocation6], %s657_s25  ;;  %s456_s4 = scalar_lea.hbm %s719_s16, 128 }
  0x34   : > { %s824_s7 = scalar_select %p710_p7, 1, 0 }
  0x35   : > { %p457_p9 = scmp.ne.s32.totalorder %s719_s16, %s456_s4  ;;  %s461_s27 = scalar_lea.hbm %s813_s1, 256 }
  0x36   : > { %p462_p3 = scmp.lt.u32.totalorder %s719_s16, %s813_s1  ;;  %p463_p6 = scmp.lt.u32.totalorder %s461_s27, %s456_s4 }
  0x37   : > { %p459_p11 = pnand %p457_p9, %p428_p5  ;;  %p465_p10 = scmp.lt.u32.totalorder %s456_s4, %s719_s16 }
  0x38   : > { %p464_p4 = por %p463_p6, %p462_p3 }
  0x39   : > { %p460_p13 = pneg %p459_p11 }
  0x3a   : > { %p466_p12 = por %p465_p10, %p464_p4 }
  0x3c   : > { %p467_p1 = pnand %p466_p12, %p460_p13 }
  0x3e   : > { %470 = shalt.err (!%p467_p1)
}
  0x3f   : > { %s471_s25 = scalar_lea.vmem %s165_s19, 128  ;;  %s575_s26 = smov [#allocation5]  }
  0x40   : > { %p472_p2 = scmp.ne.s32.totalorder %s165_s19, %s471_s25  ;;  %s476_s3 = sshll.u32 %s575_s26, 4  ;;  %s477_s3 = int_to_ptr.vmem [resolvable:$false] %s476_s3 }
  0x41   : > { %s478_s8 = scalar_lea.vmem %s477_s3, 256  ;;  %p479_p8 = scmp.lt.s32.totalorder %s165_s19, %s477_s3 }
  0x42   : > { %p474_p9 = pnand %p472_p2, %p428_p5  ;;  %p480_p7 = scmp.lt.s32.totalorder %s478_s8, %s471_s25 }
  0x44   : > { %p475_p11 = pneg %p474_p9  ;;  %p481_p3 = por %p480_p7, %p479_p8 }
  0x46   : > { %p482_p6 = pnand %p481_p3, %p475_p11 }
  0x48   : > { %485 = shalt.err (!%p482_p6)
}
  0x49   : > { %370 = dma.hbm_to_vmem [thread:$0]  (!%p674_p0), %s719_s16, 128, %s165_s19, %s153_s30  }
  0x4a   : > { %p825_p13 = scmp.ne.s32.totalorder %s824_s7, 0 }
  0x4b   : > { %s746_s15 = sand.u32 (!%p825_p13), 1, %s556_s10   ;;  %p826_p5 = scmp.ne.s32.totalorder (!%p825_p13), %s818_s21, 0 }
  0x4c   : > { %173 = sbr.rel (%p825_p13) target bundleno = 112 (0x70), region = 28  ;;  %s351_s18 = sshll.u32 (!%p825_p13), %s746_s15, 3 }
  0x4d   : > { %s176_s4 = scalar_lea.sflag (!%p825_p13), [#allocation3], %s746_s15  ;;  %s179_s6 = scalar_lea.vmem (!%p825_p13), [#allocation2], %s351_s18 }
  0x53   : > { %539 = dma.done.wait (%p826_p5), %s176_s4, 128  }
  0x54   : > { %541 = vsyncadd (%p826_p5), %s176_s4, 4294967168  ;;  %s185_s5 = scalar_lea.sflag [#allocation6], %s746_s15  ;;  %s188_s16 = scalar_lea.vmem [#allocation5], %s351_s18 }
  0x55   : > { %543 = dma.done.wait (%p826_p5), %s185_s5, 128  }
  0x56   : > { %545 = vsyncadd (%p826_p5), %s185_s5, 4294967168  ;;  %v219_v0 = vld [vmem:[%s179_s6] sm:$0xff]  ;;  %v220_v1 = vld [vmem:[%s188_s16] sm:$0xff]  ;;  %s355_s7 = sshll.u32 %s564_s12, 7  ;;  %s213_s19 = scalar_lea.vmem [#allocation7], %s351_s18 }
  0x57   : > { %s239_s30 = sshll.u32 %s213_s19, 4  ;;  %v221_v2 = vsub.f32 %v219_v0, %v220_v1  ;;  %s763_s28 = scalar_lea.hbm %s814_s2, %s355_s7  ;;  %s765_s30 = int_to_ptr.vmem [resolvable:$true] %s239_s30 }
  0x58   : > { %s226_s21 = scalar_lea.sflag [#allocation4], %s746_s15  ;;  %s486_s29 = scalar_lea.vmem %s765_s30, 128 }
  0x59   : > { %224 = vst [vmem:[%s213_s19] sm:$0xff] %v221_v2  ;;  %p487_p8 = scmp.ne.s32.totalorder %s765_s30, %s486_s29  ;;  %p827_p0 = scmp.ne.s32.totalorder %s819_s22, 0 }
  0x5a   : > { %s576_s12 = smov [#allocation7]  }
  0x5b   : > { %p488_p7 = pnand %p487_p8, %p827_p0  ;;  %s490_s25 = sshll.u32 %s576_s12, 4  ;;  %s491_s25 = int_to_ptr.vmem [resolvable:$false] %s490_s25 }
  0x5c   : > { %s492_s26 = scalar_lea.vmem %s491_s25, 256  ;;  %p493_p10 = scmp.lt.s32.totalorder %s765_s30, %s491_s25 }
  0x5d   : > { %p489_p4 = pneg %p488_p7  ;;  %p494_p12 = scmp.lt.s32.totalorder %s492_s26, %s486_s29 }
  0x5f   : > { %p495_p1 = por %p494_p12, %p493_p10 }
  0x61   : > { %p496_p2 = pnand %p495_p1, %p489_p4 }
  0x63   : > { %499 = shalt.err (!%p496_p2)
}
  0x64   : > { %s500_s3 = scalar_lea.hbm %s763_s28, 128  ;;  %s504_s18 = scalar_lea.hbm %s814_s2, 256 }
  0x65   : > { %p501_p9 = scmp.ne.s32.totalorder %s763_s28, %s500_s3  ;;  %p505_p6 = scmp.lt.u32.totalorder %s763_s28, %s814_s2 }
  0x66   : > { %p506_p13 = scmp.lt.u32.totalorder %s504_s18, %s500_s3  ;;  %p508_p8 = scmp.lt.u32.totalorder %s500_s3, %s763_s28 }
  0x67   : > { %p502_p11 = pnand %p501_p9, %p827_p0 }
  0x68   : > { %p507_p5 = por %p506_p13, %p505_p6 }
  0x69   : > { %p503_p3 = pneg %p502_p11 }
  0x6a   : > { %p509_p7 = por %p508_p8, %p507_p5 }
  0x6c   : > { %p510_p4 = pnand %p509_p7, %p503_p3 }
  0x6e   : > { %513 = shalt.err (!%p510_p4)
}
  0x6f   : > { %362 = dma.vmem_to_hbm [thread:$0]  (%p827_p0), %s765_s30, 128, %s763_s28, %s226_s21  }
  0x70 PF: > { %s251_s5 = sand.u32 1, %s552_s9   ;;  %p828_p10 = scmp.ne.s32.totalorder %s820_s24, 0 }
  0x71   : > { %p829_p12 = scmp.ge.s32.totalorder %s572_s14, 2  ;;  %s252_s16 = scalar_lea.sflag [#allocation4], %s251_s5 }
  0x73   : > { %p372_p1 = pnand %p829_p12, %p828_p10 }
  0x75   : > { %547 = dma.done.wait (!%p372_p1), %s252_s16, 128  }
  0x76   : > { %549 = vsyncadd (!%p372_p1), %s252_s16, 4294967168  ;;  %s21_s14 = sadd.s32 1, %s572_s14   ;;  %s830_s9 = smov %s556_s10 }
  0x77   : > { %p18_p2 = scmp.ge.s32.totalorder %s21_s14, 4   ;;  %s831_s10 = smov %s560_s11 }
  0x78   : > { %s832_s11 = smov %s648_s23  ;;  %s833_s12 = smov %s568_s13 }
  0x79   : > { %s834_s13 = smov %s836_s17  ;;  %20 = sbr.rel (!%p18_p2) target bundleno = 8 (0x8), region = 90 }
  0x80   :  { %257 = vsyncpa [#allocation3], 1 }
  0x81   :  { %259 = vsyncpa [#allocation3 + $0x1], 1 }
  0x82   :  { %260 = vsyncpa [#allocation6], 1 }
  0x83   :  { %262 = vsyncpa [#allocation6 + $0x1], 1 }
  0x84   :  { %263 = vsyncpa [#allocation4], 1 }
  0x85   :  { %265 = vsyncpa [#allocation4 + $0x1], 1 }

</bundles_post_ra>
